<compile_context>
chip_gen: v6e
topology: v6e:2x2x1
jax: 0.10.0
libtpu: 0.0.40
codegen_flags: <defaults>
</compile_context>

<pallas_src>
import functools

import jax
import jax.numpy as jnp
from jax.experimental import pallas as pl
from jax.experimental.pallas import tpu as pltpu

CUTOFF = 1.2759

_LANE_COL_CHOICES = (512, 384, 256, 128)   # lane-dense widths (multiples of 128)
_TARGET_BLOCK_BYTES = 6 * 1024 * 1024      # ~6 MiB/block (good on v7x 3.2 TB/s HBM)
_VMEM_LIMIT_BYTES = 40 * 1024 * 1024       # explicit scoped VMEM, safe on v5e/v6e/v7x


def _round_up(v, m):
    return ((v + m - 1) // m) * m


def _sublane(itemsize):
    if itemsize >= 4:
        return 8
    if itemsize == 2:
        return 16
    return 32


def _choose_block_rows(rows, cols, itemsize):
    sub = _sublane(itemsize)
    if rows <= sub:
        return rows                       # single full-extent block (always legal)
    target = max(sub, _TARGET_BLOCK_BYTES // (cols * itemsize))
    target = _round_up(target, sub)
    # Keep >= 2 grid steps whenever data spans more than one block so the
    # "parallel" axis can be sharded across v7x's two TensorCores and the
    # double-buffer pipeline has iterations to overlap (neutral on v5e/v6e).
    half = _round_up(pl.cdiv(rows, 2), sub)
    return max(sub, min(target, half))


def _leaky_silu_kernel(x_ref, o_ref, *, cutoff):
    x = x_ref[...]
    half = jnp.asarray(0.5, x.dtype)
    one = jnp.asarray(1.0, x.dtype)
    # silu(x) = x*sigmoid(x) = 0.5*x*(tanh(x/2)+1): one EUP op per element.
    silu = (half * x) * (jnp.tanh(half * x) + one)
    if cutoff > 0:
        taken = x                          # relu(x) == x whenever x > cutoff > 0
    else:
        taken = jnp.maximum(x, jnp.zeros_like(x))
    o_ref[...] = jnp.where(x > cutoff, taken, silu)


def _leaky_silu_jnp(x, cutoff):
    """Plain-jnp fallback for tiny / ragged-tail pieces (same math as kernel)."""
    silu = (0.5 * x) * (jnp.tanh(0.5 * x) + 1.0)
    taken = x if cutoff > 0 else jnp.maximum(x, 0)
    return jnp.where(x > cutoff, taken, silu).astype(x.dtype)


def _run_kernel_2d(x2, cutoff):
    rows, cols = x2.shape
    itemsize = jnp.dtype(x2.dtype).itemsize
    block_rows = _choose_block_rows(rows, cols, itemsize)
    grid = (pl.cdiv(rows, block_rows),)
    kernel = functools.partial(_leaky_silu_kernel, cutoff=cutoff)
    n = rows * cols
    cost = pl.CostEstimate(
        flops=5 * n,
        transcendentals=n,
        bytes_accessed=2 * n * itemsize,
    )
    return pl.pallas_call(
        kernel,
        out_shape=jax.ShapeDtypeStruct((rows, cols), x2.dtype),
        grid=grid,
        in_specs=[pl.BlockSpec((block_rows, cols), lambda i: (i, 0))],
        out_specs=pl.BlockSpec((block_rows, cols), lambda i: (i, 0)),
        compiler_params=pltpu.CompilerParams(
            dimension_semantics=("parallel",),
            vmem_limit_bytes=_VMEM_LIMIT_BYTES,
        ),
        cost_estimate=cost,
    )(x2)


def leaky_silu(x, cutoff=CUTOFF):
    """Elementwise LeakySiLU. Accepts any shape; bulk computed in a Pallas kernel."""
    orig_shape = x.shape
    n = x.size
    if n == 0:
        return x

    # Preferred path: a lane-dense column width that divides n exactly.
    # No padding, no slicing — just reshapes around one pallas_call; ragged
    # row counts are handled by pl.cdiv + Pallas boundary masking.
    for cols in _LANE_COL_CHOICES:
        if n % cols == 0:
            out2 = _run_kernel_2d(x.reshape(n // cols, cols), cutoff)
            return out2.reshape(orig_shape)

    # Ragged case: kernel on the 512-divisible bulk, plain jnp on the <512-elem
    # tail.  Avoids the pad + slice round-trips over the whole array.
    cols = _LANE_COL_CHOICES[0]
    bulk = (n // cols) * cols
    flat = x.reshape(-1)
    if bulk == 0:
        # TODO(synk): arrays with < 128 usable lane elements stay in plain jnp.
        return _leaky_silu_jnp(flat, cutoff).reshape(orig_shape)
    bulk_out = _run_kernel_2d(flat[:bulk].reshape(bulk // cols, cols), cutoff)
    tail_out = _leaky_silu_jnp(flat[bulk:], cutoff)
    return jnp.concatenate([bulk_out.reshape(-1), tail_out]).reshape(orig_shape)


def _leaky_silu_ref(x, cutoff=CUTOFF):
    """Direct transcription of the PyTorch forward."""
    b = (x > cutoff).astype(x.dtype)
    input2 = x * b
    relu_applied = jnp.maximum(input2, 0)
    silu_applied = x * jax.nn.sigmoid(x)
    return relu_applied * b + (1 - b) * silu_applied


if __name__ == "__main__":
    key = jax.random.PRNGKey(0)

    # 1) Small NCHW input consistent with typical usage of this activation.
    x = jax.random.normal(key, (2, 4, 16, 16), dtype=jnp.float32) * 2.0
    out = jax.block_until_ready(leaky_silu(x))
    ref = _leaky_silu_ref(x)
    assert out.shape == x.shape and out.dtype == x.dtype
    assert jnp.allclose(out, ref, atol=1e-5, rtol=1e-5), "mismatch (f32 NCHW)"

    # 2) Multi-block path (grid > 1, ragged final row block).
    y = jax.random.normal(jax.random.PRNGKey(1), (5, 8, 512), dtype=jnp.float32) * 2.0
    out_y = jax.block_until_ready(leaky_silu(y))
    assert jnp.allclose(out_y, _leaky_silu_ref(y), atol=1e-5, rtol=1e-5), "mismatch (multi-block)"

    # 3) Odd, non-128-divisible shape (pure-jnp fallback path).
    z = jax.random.normal(jax.random.PRNGKey(2), (3, 5, 7), dtype=jnp.float32) * 3.0
    out_z = jax.block_until_ready(leaky_silu(z))
    assert out_z.shape == z.shape
    assert jnp.allclose(out_z, _leaky_silu_ref(z), atol=1e-5, rtol=1e-5), "mismatch (odd shape)"

    # 4) Ragged bulk + tail path (kernel on bulk, jnp on the <512-elem remainder).
    w = jax.random.normal(jax.random.PRNGKey(3), (3, 300), dtype=jnp.float32) * 2.0
    out_w = jax.block_until_ready(leaky_silu(w))
    assert out_w.shape == w.shape
    assert jnp.allclose(out_w, _leaky_silu_ref(w), atol=1e-5, rtol=1e-5), "mismatch (bulk+tail)"

    print("KERNEL_OK")
</pallas_src>

<mosaic_0001>
module attributes {stable_mosaic.version = 11 : i64} {
  func.func @_leaky_silu_kernel(%arg0: i32, %arg1: memref<4x512xf32, #tpu.memory_space<vmem>>, %arg2: memref<4x512xf32, #tpu.memory_space<vmem>>) attributes {dimension_semantics = [#tpu.dimension_semantics<parallel>], iteration_bounds = array<i64: 1>, scalar_prefetch = 0 : i64, scratch_operands = 0 : i64, tpu.core_type = #tpu.core_type<tc>, window_params = [{transform_indices = @transform_0, window_bounds = array<i64: 4, 512>}, {transform_indices = @transform_1, window_bounds = array<i64: 4, 512>}]} {
    %c0 = arith.constant 0 : index
    %c0_0 = arith.constant 0 : index
    %0 = vector.load %arg1[%c0, %c0_0] : memref<4x512xf32, #tpu.memory_space<vmem>>, vector<4x512xf32>
    %cst = arith.constant 5.000000e-01 : f32
    %1 = vector.broadcast %cst : f32 to vector<4x512xf32>
    %2 = arith.mulf %1, %0 : vector<4x512xf32>
    %cst_1 = arith.constant 5.000000e-01 : f32
    %3 = vector.broadcast %cst_1 : f32 to vector<4x512xf32>
    %4 = arith.mulf %3, %0 : vector<4x512xf32>
    %5 = math.tanh %4 : vector<4x512xf32>
    %cst_2 = arith.constant 1.000000e+00 : f32
    %6 = vector.broadcast %cst_2 : f32 to vector<4x512xf32>
    %7 = arith.addf %5, %6 : vector<4x512xf32>
    %8 = arith.mulf %2, %7 : vector<4x512xf32>
    %cst_3 = arith.constant 1.275900e+00 : f32
    %9 = vector.broadcast %cst_3 : f32 to vector<4x512xf32>
    %10 = arith.cmpf ogt, %0, %9 : vector<4x512xf32>
    %11 = arith.select %10, %0, %8 : vector<4x512xi1>, vector<4x512xf32>
    %c0_4 = arith.constant 0 : index
    %c0_5 = arith.constant 0 : index
    %12 = vector.load %arg2[%c0_4, %c0_5] : memref<4x512xf32, #tpu.memory_space<vmem>>, vector<4x512xf32>
    tpu.vector_store %arg2[%c0_4, %c0_5], %11 {strides = array<i32>} : memref<4x512xf32, #tpu.memory_space<vmem>>, vector<4x512xf32>,
    return
  }
  func.func @transform_0(%arg0: i32) -> (i32, i32) {
    %c0_i32 = arith.constant 0 : i32
    %c0_i32_0 = arith.constant 0 : i32
    return %arg0, %c0_i32 : i32, i32
  }
  func.func @transform_1(%arg0: i32) -> (i32, i32) {
    %c0_i32 = arith.constant 0 : i32
    %c0_i32_0 = arith.constant 0 : i32
    return %arg0, %c0_i32 : i32, i32
  }
}

</mosaic_0001>

<bundles_post_ra>
// kernel: tpu_custom_call.1
= control target key start
LH: loop header
LB: loop body
LE: loop exit
PB: predicated region body
PF: predicated region fallthrough
CT: control target
= control target key end

     0   :  { %6 = vsyncpa [#allocation3], 0  ;;  %s120_s0 = inlined_call_operand.hbm [shape: f32[4,512], index: 0, kind: input, shape index: {}]   ;;  %s121_s1 = inlined_call_operand.hbm [shape: f32[4,512], index: 1, kind: output, shape index: {}]  }
   0x1   :  { %7 = vsyncpa [#allocation4], 0  ;;  %s102_s6 = smov [#allocation2]  }
   0x2   :  { %s14_s7 = sshll.u32 %s102_s6, 4  ;;  %s15_s7 = int_to_ptr.vmem [resolvable:$true] %s14_s7 }
   0x3   :  { %s66_s8 = scalar_lea.vmem %s15_s7, 256  ;;  %p71_p1 = scmp.lt.s32.totalorder %s15_s7, %s15_s7 }
   0x4   :  { %p67_p0 = scmp.ne.s32.totalorder %s15_s7, %s66_s8  ;;  %p72_p2 = scmp.lt.s32.totalorder %s66_s8, %s66_s8 }
   0x6   :  { %p73_p3 = por %p72_p2, %p71_p1 }
   0x8   :  { %p74_p4 = pnand %p73_p3, %p67_p0 }
   0xa   :  { %77 = shalt.err (!%p74_p4)
}
   0xb   :  { %17 = dma.hbm_to_vmem [thread:$0]  %s120_s0, 256, %s15_s7, [#allocation3]  }
   0xc   :  { %98 = dma.done.wait [#allocation3], 256  }
   0xd   :  { %99 = vsyncadd [#allocation3], 4294967040  ;;  %v21_v0 = vld [vmem:[#allocation2] sm:$0xff]  ;;  %v22_v1 = vld [vmem:[#allocation2 + $0x8] sm:$0xff]  ;;  %s103_s11 = smov [#allocation5]  }
   0xe   :  { %v23_v2 = vmul.f32 0.5, %v21_v0  ;;  %v24_v3 = vmul.f32 0.5, %v22_v1  ;;  %vm31_vm0 = vcmp.gt.f32.partialorder %v21_v0, 1.2759  ;;  %s43_s12 = sshll.u32 %s103_s11, 4  ;;  %s44_s12 = int_to_ptr.vmem [resolvable:$true] %s43_s12 }
   0xf   :  { %vm32_vm1 = vcmp.gt.f32.partialorder %v22_v1, 1.2759  ;;  %s78_s0 = scalar_lea.vmem %s44_s12, 256  ;;  %p83_p6 = scmp.lt.s32.totalorder %s44_s12, %s44_s12 }
  0x10   :  { %54 = vtanh.f32 %v23_v2  ;;  %p79_p5 = scmp.ne.s32.totalorder %s44_s12, %s78_s0  ;;  %p84_p7 = scmp.lt.s32.totalorder %s78_s0, %s78_s0 }
  0x11   :  { %56 = vtanh.f32 %v24_v3 }
  0x12   :  { %p85_p8 = por %p84_p7, %p83_p6 }
  0x14   :  { %p86_p9 = pnand %p85_p8, %p79_p5 }
  0x1d   :  { %v55_v4 = vpop.eup %54 }
  0x1e   :  { %v57_v5 = vpop.eup %56  ;;  %v27_v6 = vadd.f32 1.0, %v55_v4 }
  0x1f   :  { %v28_v7 = vadd.f32 1.0, %v57_v5 }
  0x20   :  { %v29_v8 = vmul.f32 %v27_v6, %v23_v2 }
  0x21   :  { %v30_v9 = vmul.f32 %v28_v7, %v24_v3 }
  0x22   :  { %v33_v10 = vsel %vm31_vm0, %v21_v0, %v29_v8 }
  0x23   :  { %35 = vst [vmem:[#allocation5] sm:$0xff] %v33_v10  ;;  %v34_v11 = vsel %vm32_vm1, %v22_v1, %v30_v9 }
  0x24   :  { %36 = vst [vmem:[#allocation5 + $0x8] sm:$0xff] %v34_v11 }
  0x25   :  { %89 = shalt.err (!%p86_p9)
}
  0x26   :  { %46 = dma.vmem_to_hbm [thread:$0]  %s44_s12, 256, %s121_s1, [#allocation4]  }
  0x27   :  { %100 = dma.done.wait [#allocation4], 256  }
  0x28   :  { %101 = vsyncadd [#allocation4], 4294967040 }
  0x29   :  { %50 = vsyncpa [#allocation3], 1 }
  0x2a   :  { %51 = vsyncpa [#allocation4], 1 }

</bundles_post_ra>
